<compile_context>
chip_gen: v7x
topology: tpu7x:2x2x1
jax: 0.10.0
libtpu: 0.0.40
codegen_flags: <defaults>
</compile_context>

<pallas_src>
import jax
import jax.numpy as jnp
from jax.experimental import pallas as pl
from jax.experimental.pallas import tpu as pltpu


def _round_up(a, m):
    return (a + m - 1) // m * m


def mlp_head_kernel(x_ref, w1_ref, w2_ref, w3_ref, bias_ref, o_ref, acc_ref):
    """Grid: (batch_tiles, k_tiles).  K (feature) axis is the reduction axis."""
    k = pl.program_id(1)

    @pl.when(k == 0)
    def _():
        acc_ref[...] = jnp.zeros_like(acc_ref)

    # Layer 1 partial: bf16 x tile @ bf16 W1 tile on the MXU, f32 accumulation.
    acc_ref[...] += jnp.dot(x_ref[...], w1_ref[...],
                            preferred_element_type=jnp.float32)

    @pl.when(k == pl.num_programs(1) - 1)
    def _():
        b1 = bias_ref[0:1, :]            # (1, H) f32
        b2 = bias_ref[1:2, :]            # (1, H) f32
        b3 = bias_ref[2:3, 0:1]          # (1, 1) f32
        # Layer 1 finalize: bias + ReLU (Dropout is identity in eval).
        h1 = jnp.maximum(acc_ref[...] + b1, 0.0)
        # Hidden layer (hidden_layers == 1): Linear(H -> H) + ReLU.
        h2 = jnp.dot(h1.astype(jnp.bfloat16), w2_ref[...],
                     preferred_element_type=jnp.float32)
        h2 = jnp.maximum(h2 + b2, 0.0)
        # Output head (H -> 1): VPU/XLU lane reduction instead of an N=1 matmul.
        w3_row = w3_ref[...].astype(jnp.float32)           # (1, H)
        z = jnp.sum(h2 * w3_row, axis=-1, keepdims=True) + b3
        p = jax.nn.sigmoid(z)                              # f32 sigmoid (v5e-safe)
        # Lane-dense store; wrapper slices column 0.
        o_ref[...] = jnp.broadcast_to(p, o_ref.shape).astype(o_ref.dtype)
    # TODO(synk): dropout masks omitted (inference/eval semantics).


def prepare_mlp_params(params, *, tk_max=2048):
    """One-time weight repacking (bf16 cast, padding, bias packing).

    Do NOT call this per forward: the packed weights are reused across calls so
    the per-call HBM traffic is only the x stream + the kernel's own reads.
    """
    w1, b1, w2, b2, w3, b3 = params
    F, H = w1.shape
    H_pad = _round_up(H, 128)

    # Feature (K) tiling decided once, from the static feature width.
    F_align = _round_up(F, 128)
    TK = F_align if F_align <= tk_max else tk_max
    F_pad = _round_up(F, TK)

    w1_p = jnp.zeros((F_pad, H_pad), jnp.bfloat16).at[:F, :H].set(
        w1.astype(jnp.bfloat16))
    w2_p = jnp.zeros((H_pad, H_pad), jnp.bfloat16).at[:H, :H].set(
        w2.astype(jnp.bfloat16))
    w3_p = jnp.zeros((1, H_pad), jnp.bfloat16).at[0, :H].set(
        w3.reshape(H).astype(jnp.bfloat16))
    bias_pack = jnp.zeros((3, H_pad), jnp.float32)
    bias_pack = bias_pack.at[0, :H].set(b1.reshape(H))
    bias_pack = bias_pack.at[1, :H].set(b2.reshape(H))
    bias_pack = bias_pack.at[2, 0].set(b3.reshape(()))

    prepared = jax.device_put((w1_p, w2_p, w3_p, bias_pack))
    meta = dict(F=F, F_pad=F_pad, TK=TK, H=H, H_pad=H_pad)
    return prepared, meta


def mlp_binary_classifier_forward(x_feat, prepared, meta):
    """x_feat: [B, in_features] features (output of pre_forward)."""
    w1_p, w2_p, w3_p, bias_pack = prepared
    B, F = x_feat.shape
    assert F == meta["F"], (F, meta["F"])
    F_pad, TK, H_pad = meta["F_pad"], meta["TK"], meta["H_pad"]

    # ---- batch (M) tiling ----
    TM_MAX = 512
    B_pad = _round_up(B, 8)
    TM = min(B_pad, TM_MAX)
    # v7x: guarantee >= 2 batch tiles so the "parallel" axis spans both
    # TensorCores (harmless on single-TC v5e/v6e).
    if B_pad >= 16 and B_pad // TM < 2:
        TM = _round_up((B_pad + 1) // 2, 8)
    B_pad = _round_up(B_pad, TM)

    # ---- x stream: bf16, avoid a separate padded copy when aligned ----
    x_bf = x_feat.astype(jnp.bfloat16)
    if B_pad != B or F_pad != F:
        # Single fused producer (cast + pad) under jit; common aligned case
        # skips this entirely.
        x_bf = jnp.pad(x_bf, ((0, B_pad - B), (0, F_pad - F)))

    grid = (B_pad // TM, F_pad // TK)

    # ---- VMEM budget from real buffer sizes (+25% headroom) ----
    est_bytes = (2 * TM * TK * 2            # x blocks (bf16, double-buffered)
                 + 2 * TK * H_pad * 2       # W1 blocks (bf16, double-buffered)
                 + 2 * H_pad * H_pad * 2    # W2 (resident, conservatively x2)
                 + 2 * 1 * H_pad * 2        # W3 row
                 + 2 * 3 * H_pad * 4        # packed biases
                 + 2 * TM * 128 * 4         # output blocks (f32)
                 + TM * H_pad * 4)          # accumulator scratch
    vmem_limit = max(int(est_bytes * 1.25), 8 * 2 ** 20)

    out = pl.pallas_call(
        mlp_head_kernel,
        out_shape=jax.ShapeDtypeStruct((B_pad, 128), jnp.float32),
        grid_spec=pltpu.PrefetchScalarGridSpec(
            num_scalar_prefetch=0,
            grid=grid,
            in_specs=[
                pl.BlockSpec((TM, TK), lambda i, k: (i, k)),       # x tile (bf16)
                pl.BlockSpec((TK, H_pad), lambda i, k: (k, 0)),    # W1 tile (bf16)
                pl.BlockSpec((H_pad, H_pad), lambda i, k: (0, 0)),  # W2 (resident)
                pl.BlockSpec((1, H_pad), lambda i, k: (0, 0)),     # W3 row
                pl.BlockSpec((3, H_pad), lambda i, k: (0, 0)),     # packed biases
            ],
            out_specs=pl.BlockSpec((TM, 128), lambda i, k: (i, 0)),
            scratch_shapes=[pltpu.VMEM((TM, H_pad), jnp.float32)],
        ),
        compiler_params=pltpu.CompilerParams(
            dimension_semantics=("parallel", "arbitrary"),
            vmem_limit_bytes=vmem_limit,
        ),
    )(x_bf, w1_p, w2_p, w3_p, bias_pack)

    return out[:B, :1]


def pre_forward(x_nchw):
    # Stand-in for the abstract pretrained model: flatten NCHW -> [B, C*H*W].
    # TODO(synk): abstract `create_pretrained_model` has no concrete
    # definition; using identity flatten as the deterministic feature extractor.
    B = x_nchw.shape[0]
    return x_nchw.reshape(B, -1).astype(jnp.float32)


def init_linear(key, fan_in, fan_out):
    # Matches torch.nn.Linear default init: U(-1/sqrt(fan_in), 1/sqrt(fan_in)).
    kw, kb = jax.random.split(key)
    bound = 1.0 / jnp.sqrt(jnp.float32(fan_in))
    w = jax.random.uniform(kw, (fan_in, fan_out), jnp.float32, -bound, bound)
    b = jax.random.uniform(kb, (1, fan_out), jnp.float32, -bound, bound)
    return w, b


def make_transfer_mlp_forward(prepared, meta):
    """Returns a jitted forward: NCHW image -> [B, 1] probability."""
    def fwd(x_nchw, prep):
        feats = pre_forward(x_nchw)
        return mlp_binary_classifier_forward(feats, prep, meta)
    jitted = jax.jit(fwd)
    return lambda x_nchw: jitted(x_nchw, prepared)


if __name__ == "__main__":
    key = jax.random.PRNGKey(0)
    B, C, Hs, Ws = 2, 4, 16, 16          # small NCHW input
    in_features = C * Hs * Ws            # 1024
    units_per_layer = 128                # default units_per_layer
    # hidden_layers = 1 (default)

    k_in, k1, k2, k3 = jax.random.split(key, 4)
    x = jax.random.normal(k_in, (B, C, Hs, Ws), jnp.float32)

    w1, b1 = init_linear(k1, in_features, units_per_layer)
    w2, b2 = init_linear(k2, units_per_layer, units_per_layer)
    w3, b3 = init_linear(k3, units_per_layer, 1)
    params = (w1, b1, w2, b2, w3, b3)

    prepared, meta = prepare_mlp_params(params)      # one-time weight prep
    forward = make_transfer_mlp_forward(prepared, meta)

    out = forward(x)
    out = jax.block_until_ready(out)

    # Reference in plain JAX, mirroring the kernel's bf16 rounding points
    # (f32 accumulation everywhere), with relaxed tolerance for bf16 matmuls.
    feats = pre_forward(x)
    xf = feats.astype(jnp.bfloat16).astype(jnp.float32)
    w1f = w1.astype(jnp.bfloat16).astype(jnp.float32)
    w2f = w2.astype(jnp.bfloat16).astype(jnp.float32)
    w3f = w3.astype(jnp.bfloat16).astype(jnp.float32)
    hp = jax.lax.Precision.HIGHEST
    h = jnp.maximum(jnp.dot(xf, w1f, precision=hp) + b1, 0.0)
    h = h.astype(jnp.bfloat16).astype(jnp.float32)
    h = jnp.maximum(jnp.dot(h, w2f, precision=hp) + b2, 0.0)
    ref = jax.nn.sigmoid(jnp.dot(h, w3f, precision=hp) + b3)

    assert out.shape == (B, 1), out.shape
    assert jnp.allclose(out, ref, atol=2e-2), (out, ref)

    print("KERNEL_OK")
</pallas_src>

<mosaic_0001>
module attributes {stable_mosaic.version = 11 : i64} {
  func.func @mlp_head_kernel(%arg0: i32, %arg1: i32, %arg2: memref<8x1024xbf16, #tpu.memory_space<vmem>>, %arg3: memref<1024x128xbf16, #tpu.memory_space<vmem>>, %arg4: memref<128x128xbf16, #tpu.memory_space<vmem>>, %arg5: memref<1x128xbf16, #tpu.memory_space<vmem>>, %arg6: memref<3x128xf32, #tpu.memory_space<vmem>>, %arg7: memref<8x128xf32, #tpu.memory_space<vmem>>, %arg8: memref<8x128xf32, #tpu.memory_space<vmem>>) attributes {dimension_semantics = [#tpu.dimension_semantics<parallel>, #tpu.dimension_semantics<arbitrary>], iteration_bounds = array<i64: 1, 1>, scalar_prefetch = 0 : i64, scratch_operands = 1 : i64, tpu.core_type = #tpu.core_type<tc>, window_params = [{transform_indices = @transform_0, window_bounds = array<i64: 8, 1024>}, {transform_indices = @transform_1, window_bounds = array<i64: 1024, 128>}, {pipeline_mode = #tpu.pipeline_mode<synchronous>, transform_indices = @transform_2, window_bounds = array<i64: 128, 128>}, {pipeline_mode = #tpu.pipeline_mode<synchronous>, transform_indices = @transform_3, window_bounds = array<i64: 1, 128>}, {pipeline_mode = #tpu.pipeline_mode<synchronous>, transform_indices = @transform_4, window_bounds = array<i64: 3, 128>}, {transform_indices = @transform_5, window_bounds = array<i64: 8, 128>}]} {
    %c0_i32 = arith.constant 0 : i32
    %0 = arith.cmpi eq, %arg1, %c0_i32 : i32
    %1 = arith.extui %0 : i1 to i32
    %c0_i32_0 = arith.constant 0 : i32
    %2 = arith.cmpi ne, %1, %c0_i32_0 : i32
    scf.if %2 {
      %cst_10 = arith.constant 0.000000e+00 : f32
      %12 = vector.broadcast %cst_10 : f32 to vector<8x128xf32>
      %c0_11 = arith.constant 0 : index
      %c0_12 = arith.constant 0 : index
      %13 = vector.load %arg8[%c0_11, %c0_12] : memref<8x128xf32, #tpu.memory_space<vmem>>, vector<8x128xf32>
      tpu.vector_store %arg8[%c0_11, %c0_12], %12 {strides = array<i32>} : memref<8x128xf32, #tpu.memory_space<vmem>>, vector<8x128xf32>,
    } else {
    }
    %c0 = arith.constant 0 : index
    %c0_1 = arith.constant 0 : index
    %3 = vector.load %arg8[%c0, %c0_1] : memref<8x128xf32, #tpu.memory_space<vmem>>, vector<8x128xf32>
    %c0_2 = arith.constant 0 : index
    %c0_3 = arith.constant 0 : index
    %4 = vector.load %arg2[%c0_2, %c0_3] : memref<8x1024xbf16, #tpu.memory_space<vmem>>, vector<8x1024xbf16>
    %c0_4 = arith.constant 0 : index
    %c0_5 = arith.constant 0 : index
    %5 = vector.load %arg3[%c0_4, %c0_5] : memref<1024x128xbf16, #tpu.memory_space<vmem>>, vector<1024x128xbf16>
    %cst = arith.constant dense<0.000000e+00> : vector<8x128xf32>
    %6 = tpu.matmul %4, %5, %cst {dimension_numbers = #tpu.dot_dimension_numbers<[1], [0], [0], [1], [0, 0, 1, 1], [], []>} : vector<8x1024xbf16>, vector<1024x128xbf16>, vector<8x128xf32> -> vector<8x128xf32>
    %7 = arith.addf %3, %6 : vector<8x128xf32>
    %c0_6 = arith.constant 0 : index
    %c0_7 = arith.constant 0 : index
    %8 = vector.load %arg8[%c0_6, %c0_7] : memref<8x128xf32, #tpu.memory_space<vmem>>, vector<8x128xf32>
    tpu.vector_store %arg8[%c0_6, %c0_7], %7 {strides = array<i32>} : memref<8x128xf32, #tpu.memory_space<vmem>>, vector<8x128xf32>,
    %c0_i32_8 = arith.constant 0 : i32
    %9 = arith.cmpi eq, %arg1, %c0_i32_8 : i32
    %10 = arith.extui %9 : i1 to i32
    %c0_i32_9 = arith.constant 0 : i32
    %11 = arith.cmpi ne, %10, %c0_i32_9 : i32
    scf.if %11 {
      %c0_10 = arith.constant 0 : index
      %c0_11 = arith.constant 0 : index
      %12 = vector.load %arg6[%c0_10, %c0_11] : memref<3x128xf32, #tpu.memory_space<vmem>>, vector<1x128xf32>
      %c1 = arith.constant 1 : index
      %c0_12 = arith.constant 0 : index
      %13 = vector.load %arg6[%c1, %c0_12] : memref<3x128xf32, #tpu.memory_space<vmem>>, vector<1x128xf32>
      %c2 = arith.constant 2 : index
      %c0_13 = arith.constant 0 : index
      %14 = vector.load %arg6[%c2, %c0_13] : memref<3x128xf32, #tpu.memory_space<vmem>>, vector<1x1xf32>
      %c0_14 = arith.constant 0 : index
      %c0_15 = arith.constant 0 : index
      %15 = vector.load %arg8[%c0_14, %c0_15] : memref<8x128xf32, #tpu.memory_space<vmem>>, vector<8x128xf32>
      %16 = vector.broadcast %12 : vector<1x128xf32> to vector<8x128xf32>
      %17 = arith.addf %15, %16 : vector<8x128xf32>
      %cst_16 = arith.constant 0.000000e+00 : f32
      %18 = vector.broadcast %cst_16 : f32 to vector<8x128xf32>
      %19 = arith.maximumf %17, %18 : vector<8x128xf32>
      %20 = arith.truncf %19 : vector<8x128xf32> to vector<8x128xbf16>
      %c0_17 = arith.constant 0 : index
      %c0_18 = arith.constant 0 : index
      %21 = vector.load %arg4[%c0_17, %c0_18] : memref<128x128xbf16, #tpu.memory_space<vmem>>, vector<128x128xbf16>
      %cst_19 = arith.constant dense<0.000000e+00> : vector<8x128xf32>
      %22 = tpu.matmul %20, %21, %cst_19 {dimension_numbers = #tpu.dot_dimension_numbers<[1], [0], [0], [1], [0, 0, 1, 1], [], []>} : vector<8x128xbf16>, vector<128x128xbf16>, vector<8x128xf32> -> vector<8x128xf32>
      %23 = vector.broadcast %13 : vector<1x128xf32> to vector<8x128xf32>
      %24 = arith.addf %22, %23 : vector<8x128xf32>
      %cst_20 = arith.constant 0.000000e+00 : f32
      %25 = vector.broadcast %cst_20 : f32 to vector<8x128xf32>
      %26 = arith.maximumf %24, %25 : vector<8x128xf32>
      %c0_21 = arith.constant 0 : index
      %c0_22 = arith.constant 0 : index
      %27 = vector.load %arg5[%c0_21, %c0_22] : memref<1x128xbf16, #tpu.memory_space<vmem>>, vector<1x128xbf16>
      %28 = arith.extf %27 : vector<1x128xbf16> to vector<1x128xf32>
      %29 = vector.broadcast %28 : vector<1x128xf32> to vector<8x128xf32>
      %30 = arith.mulf %26, %29 : vector<8x128xf32>
      %cst_23 = arith.constant dense<0.000000e+00> : vector<8xf32>
      %31 = vector.multi_reduction <add>, %30, %cst_23 [1] : vector<8x128xf32> to vector<8xf32>
      %32 = vector.shape_cast %31 : vector<8xf32> to vector<8x1xf32>
      %33 = vector.broadcast %14 : vector<1x1xf32> to vector<8x1xf32>
      %34 = arith.addf %32, %33 : vector<8x1xf32>
      %35 = arith.negf %34 : vector<8x1xf32>
      %36 = math.exp %35 : vector<8x1xf32>
      %cst_24 = arith.constant 1.000000e+00 : f32
      %37 = vector.broadcast %cst_24 : f32 to vector<8x1xf32>
      %38 = arith.addf %37, %36 : vector<8x1xf32>
      %39 = arith.divf %37, %38 : vector<8x1xf32>
      %40 = vector.shape_cast %39 : vector<8x1xf32> to vector<8x1xf32>
      %41 = vector.broadcast %40 : vector<8x1xf32> to vector<8x128xf32>
      %c0_25 = arith.constant 0 : index
      %c0_26 = arith.constant 0 : index
      %42 = vector.load %arg7[%c0_25, %c0_26] : memref<8x128xf32, #tpu.memory_space<vmem>>, vector<8x128xf32>
      tpu.vector_store %arg7[%c0_25, %c0_26], %41 {strides = array<i32>} : memref<8x128xf32, #tpu.memory_space<vmem>>, vector<8x128xf32>,
    } else {
    }
    return
  }
  func.func @transform_0(%arg0: i32, %arg1: i32) -> (i32, i32) {
    %c0_i32 = arith.constant 0 : i32
    return %arg0, %arg1 : i32, i32
  }
  func.func @transform_1(%arg0: i32, %arg1: i32) -> (i32, i32) {
    %c0_i32 = arith.constant 0 : i32
    %c0_i32_0 = arith.constant 0 : i32
    return %arg1, %c0_i32 : i32, i32
  }
  func.func @transform_2(%arg0: i32, %arg1: i32) -> (i32, i32) {
    %c0_i32 = arith.constant 0 : i32
    %c0_i32_0 = arith.constant 0 : i32
    %c0_i32_1 = arith.constant 0 : i32
    return %c0_i32, %c0_i32_0 : i32, i32
  }
  func.func @transform_3(%arg0: i32, %arg1: i32) -> (i32, i32) {
    %c0_i32 = arith.constant 0 : i32
    %c0_i32_0 = arith.constant 0 : i32
    %c0_i32_1 = arith.constant 0 : i32
    return %c0_i32, %c0_i32_0 : i32, i32
  }
  func.func @transform_4(%arg0: i32, %arg1: i32) -> (i32, i32) {
    %c0_i32 = arith.constant 0 : i32
    %c0_i32_0 = arith.constant 0 : i32
    %c0_i32_1 = arith.constant 0 : i32
    return %c0_i32, %c0_i32_0 : i32, i32
  }
  func.func @transform_5(%arg0: i32, %arg1: i32) -> (i32, i32) {
    %c0_i32 = arith.constant 0 : i32
    %c0_i32_0 = arith.constant 0 : i32
    return %arg0, %c0_i32 : i32, i32
  }
}

</mosaic_0001>

<bundles_post_ra>
// kernel: fwd.1
= control target key start
LH: loop header
LB: loop body
LE: loop exit
PB: predicated region body
PF: predicated region fallthrough
CT: control target
= control target key end

     0   :  { %10 = vsyncpa [#allocation4], 0  ;;  %s1217_s18 = smov [#allocation3]   ;;  %s1316_s0 = inlined_call_operand.vmem [shape: bf16[8,1024], index: 0, kind: input, shape index: {}]   ;;  %s1317_s1 = inlined_call_operand.hbm [shape: bf16[1024,128], index: 1, kind: input, shape index: {}]   ;;  %s1318_s2 = inlined_call_operand.vmem [shape: bf16[128,128], index: 2, kind: input, shape index: {}]   ;;  %s1319_s3 = inlined_call_operand.vmem [shape: bf16[1,128], index: 3, kind: input, shape index: {}]   ;;  %s1320_s4 = inlined_call_operand.vmem [shape: f32[3,128], index: 4, kind: input, shape index: {}]   ;;  %s1321_s5 = inlined_call_operand.vmem [shape: f32[8,128], index: 5, kind: output, shape index: {}]  }
   0x1   :  { %s18_s19 = sshll.u32 %s1217_s18, 4  ;;  %s1193_s22 = scalar_lea.hbm %s1317_s1, 8192  ;;  %s19_s19 = int_to_ptr.vmem [resolvable:$true] %s18_s19 }
   0x2   :  { %p1194_p0 = scmp.ne.s32.totalorder %s1317_s1, %s1193_s22  ;;  %p1197_p1 = scmp.lt.u32.totalorder %s1193_s22, %s1317_s1 }
   0x4   :  { %p1199_p2 = pnand %p1197_p1, %p1194_p0 }
   0x6   :  { %1202 = shalt.err (!%p1199_p2)
}
   0x7   :  { %s1203_s27 = scalar_lea.vmem %s19_s19, 8192  ;;  %p1208_p4 = scmp.lt.s32.totalorder %s19_s19, %s19_s19 }
   0x8   :  { %p1204_p3 = scmp.ne.s32.totalorder %s19_s19, %s1203_s27  ;;  %p1209_p5 = scmp.lt.s32.totalorder %s1203_s27, %s1203_s27 }
   0xa   :  { %p1210_p6 = por %p1209_p5, %p1208_p4 }
   0xc   :  { %p1211_p7 = pnand %p1210_p6, %p1204_p3 }
   0xe   :  { %1214 = shalt.err (!%p1211_p7)
}
   0xf   :  { %s1218_s28 = smov 64   ;;  %s1219_s29 = smov 4  }
  0x10   :  { %24 = dma.hbm_to_vmem [thread:$0]  %s1317_s1, 8192, %s19_s19, [#allocation4], %s1218_s28, %s1218_s28, %s1219_s29  }
  0x11   :  { %1215 = dma.done.wait [#allocation4], 8192  }
  0x12   :  { %1216 = vsyncadd [#allocation4], 4294959104  ;;  %v1109_v0 = vld [vmem:[#allocation3 + $0x40] sm:$0xff]   ;;  %v1113_v4 = vld [vmem:[#allocation3 + $0x48] sm:$0xff]   ;;  %vm1221_vm0 = vmmov 0  }
  0x13   :  { %v1110_v1 = vld [vmem:[#allocation3 + $0xc0] sm:$0xff]   ;;  %985 = vmatprep.subr.bf16.mxu0 %v1109_v0  ;;  %v1114_v5 = vld [vmem:[#allocation3 + $0xc8] sm:$0xff]   ;;  %v1117_v8 = vld [vmem:[#allocation3 + $0x50] sm:$0xff]  }
  0x14   :  { %v1111_v2 = vld [vmem:[#allocation3] sm:$0xff]   ;;  %1007 = vmatprep.subr.bf16.mxu1 %v1110_v1  ;;  %v1115_v6 = vld [vmem:[#allocation3 + $0x8] sm:$0xff]   ;;  %v1118_v9 = vld [vmem:[#allocation3 + $0xd0] sm:$0xff]  }
  0x15   :  { %v1112_v3 = vld [vmem:[#allocation3 + $0x80] sm:$0xff]   ;;  %986 = vmatpush3.bf16.msra.mxu0 %v1111_v2  ;;  %v1116_v7 = vld [vmem:[#allocation3 + $0x88] sm:$0xff]   ;;  %v1119_v10 = vld [vmem:[#allocation3 + $0x10] sm:$0xff]  }
  0x16   :  { %1008 = vmatpush3.bf16.msra.mxu1 %v1112_v3  ;;  %987 = vmatprep.subr.bf16.mxu0 %v1113_v4  ;;  %v1120_v11 = vld [vmem:[#allocation3 + $0x90] sm:$0xff]   ;;  %v1121_v12 = vld [vmem:[#allocation3 + $0x58] sm:$0xff]   ;;  %v1125_v16 = vld [vmem:[#allocation3 + $0x60] sm:$0xff]  }
  0x17   :  { %1009 = vmatprep.subr.bf16.mxu1 %v1114_v5  ;;  %v1122_v13 = vld [vmem:[#allocation3 + $0xd8] sm:$0xff]   ;;  %v1126_v17 = vld [vmem:[#allocation3 + $0xe0] sm:$0xff]   ;;  %v1129_v20 = vld [vmem:[#allocation3 + $0x68] sm:$0xff]  }
  0x18   :  { %v1123_v14 = vld [vmem:[#allocation3 + $0x18] sm:$0xff]   ;;  %v1127_v18 = vld [vmem:[#allocation3 + $0x20] sm:$0xff]   ;;  %v1130_v21 = vld [vmem:[#allocation3 + $0xe8] sm:$0xff]  }
  0x19   :  { %988 = vmatpush3.bf16.msra.mxu0 %v1115_v6  ;;  %v1124_v15 = vld [vmem:[#allocation3 + $0x98] sm:$0xff]   ;;  %v1128_v19 = vld [vmem:[#allocation3 + $0xa0] sm:$0xff]   ;;  %v1131_v22 = vld [vmem:[#allocation3 + $0x28] sm:$0xff]  }
  0x1a   :  { %1010 = vmatpush3.bf16.msra.mxu1 %v1116_v7  ;;  %989 = vmatprep.subr.bf16.mxu0 %v1117_v8  ;;  %v1132_v23 = vld [vmem:[#allocation3 + $0xa8] sm:$0xff]   ;;  %v1133_v24 = vld [vmem:[#allocation3 + $0x70] sm:$0xff]   ;;  %v1137_v28 = vld [vmem:[#allocation3 + $0x78] sm:$0xff]  }
  0x1b   :  { %1011 = vmatprep.subr.bf16.mxu1 %v1118_v9  ;;  %v1134_v25 = vld [vmem:[#allocation3 + $0xf0] sm:$0xff]   ;;  %v1138_v29 = vld [vmem:[#allocation3 + $0xf8] sm:$0xff]   ;;  %v41_v32 = vld [vmem:[%s1316_s0] sm:$0xff] }
  0x1c   :  { %v1135_v26 = vld [vmem:[#allocation3 + $0x30] sm:$0xff]   ;;  %v1139_v30 = vld [vmem:[#allocation3 + $0x38] sm:$0xff]   ;;  %v42_v33 = vld [vmem:[%s1316_s0 + $0x8] sm:$0xff]  ;;  %v901_v34 = vcombine.low %v41_v32, %v41_v32  ;;  %v902_v35 = vcombine.high %v41_v32, %v41_v32 }
  0x1d   :  { %990 = vmatpush3.bf16.msra.mxu0 %v1119_v10  ;;  %v1136_v27 = vld [vmem:[#allocation3 + $0xb0] sm:$0xff]   ;;  %v1140_v31 = vld [vmem:[#allocation3 + $0xb8] sm:$0xff]   ;;  %v903_v36 = vcombine.low %v42_v33, %v42_v33  ;;  %v904_v37 = vcombine.high %v42_v33, %v42_v33  ;;  %v1145_v38 = vld [vmem:[#allocation3 + $0x140] sm:$0xff]  }
  0x1e   :  { %1012 = vmatpush3.bf16.msra.mxu1 %v1120_v11  ;;  %991 = vmatprep.subr.bf16.mxu0 %v1121_v12  ;;  %v1146_v39 = vld [vmem:[#allocation3 + $0x1c0] sm:$0xff]   ;;  %v1149_v42 = vld [vmem:[#allocation3 + $0x148] sm:$0xff]   ;;  %v1153_v46 = vld [vmem:[#allocation3 + $0x150] sm:$0xff]  }
  0x1f   :  { %1013 = vmatprep.subr.bf16.mxu1 %v1122_v13  ;;  %617 = vmatprep.mubr.bf16.mxu0 %v902_v35  ;;  %v1147_v40 = vld [vmem:[#allocation3 + $0x100] sm:$0xff]   ;;  %v1150_v43 = vld [vmem:[#allocation3 + $0x1c8] sm:$0xff]   ;;  %v1154_v47 = vld [vmem:[#allocation3 + $0x1d0] sm:$0xff]   ;;  %v1220_v13 = vmov 0.0  }
  0x20   :  { %657 = vmatprep.mubr.bf16.mxu1 %v904_v37  ;;  %v1148_v41 = vld [vmem:[#allocation3 + $0x180] sm:$0xff]   ;;  %v1151_v44 = vld [vmem:[#allocation3 + $0x108] sm:$0xff]   ;;  %v1155_v48 = vld [vmem:[#allocation3 + $0x110] sm:$0xff]  }
  0x21   :  { %992 = vmatpush3.bf16.msra.mxu0 %v1123_v14  ;;  %v1152_v45 = vld [vmem:[#allocation3 + $0x188] sm:$0xff]   ;;  %v1156_v49 = vld [vmem:[#allocation3 + $0x190] sm:$0xff]   ;;  %v1157_v50 = vld [vmem:[#allocation3 + $0x158] sm:$0xff]  }
  0x22   :  { %1014 = vmatpush3.bf16.msra.mxu1 %v1124_v15  ;;  %993 = vmatprep.subr.bf16.mxu0 %v1125_v16  ;;  %v1158_v51 = vld [vmem:[#allocation3 + $0x1d8] sm:$0xff]   ;;  %v1161_v54 = vld [vmem:[#allocation3 + $0x160] sm:$0xff]   ;;  %v1165_v58 = vld [vmem:[#allocation3 + $0x168] sm:$0xff]  }
  0x23   :  { %1015 = vmatprep.subr.bf16.mxu1 %v1126_v17  ;;  %v1159_v52 = vld [vmem:[#allocation3 + $0x118] sm:$0xff]   ;;  %v1162_v55 = vld [vmem:[#allocation3 + $0x1e0] sm:$0xff]   ;;  %v1166_v59 = vld [vmem:[#allocation3 + $0x1e8] sm:$0xff]  }
  0x24   :  { %v1160_v53 = vld [vmem:[#allocation3 + $0x198] sm:$0xff]   ;;  %v1163_v56 = vld [vmem:[#allocation3 + $0x120] sm:$0xff]   ;;  %v1167_v60 = vld [vmem:[#allocation3 + $0x128] sm:$0xff]  }
  0x25   :  { %994 = vmatpush3.bf16.msra.mxu0 %v1127_v18  ;;  %v1164_v57 = vld [vmem:[#allocation3 + $0x1a0] sm:$0xff]   ;;  %v1168_v61 = vld [vmem:[#allocation3 + $0x1a8] sm:$0xff]   ;;  %v1169_v62 = vld [vmem:[#allocation3 + $0x170] sm:$0xff]  }
  0x26   :  { %1016 = vmatpush3.bf16.msra.mxu1 %v1128_v19  ;;  %995 = vmatprep.subr.bf16.mxu0 %v1129_v20  ;;  %v1170_v63 = vld [vmem:[#allocation3 + $0x1f0] sm:$0xff]   ;;  %v1173_v2 = vld [vmem:[#allocation3 + $0x178] sm:$0xff]   ;;  %v1181_v12 = vld [vmem:[%s1318_s2] sm:$0xff]  }
  0x27   :  { %1017 = vmatprep.subr.bf16.mxu1 %v1130_v21  ;;  %v1171_v0 = vld [vmem:[#allocation3 + $0x130] sm:$0xff]   ;;  %v1174_v3 = vld [vmem:[#allocation3 + $0x1f8] sm:$0xff]   ;;  %v1182_v14 = vld [vmem:[%s1318_s2 + $0x8] sm:$0xff]  }
  0x28   :  { %v1172_v1 = vld [vmem:[#allocation3 + $0x1b0] sm:$0xff]   ;;  %v1175_v4 = vld [vmem:[#allocation3 + $0x138] sm:$0xff]   ;;  %v1185_v17 = vld [vmem:[%s1318_s2 + $0x20] sm:$0xff]  }
  0x29   :  { %996 = vmatpush3.bf16.msra.mxu0 %v1131_v22  ;;  %v1176_v5 = vld [vmem:[#allocation3 + $0x1b8] sm:$0xff]   ;;  %v43_v6 = vld [vmem:[%s1316_s0 + $0x10] sm:$0xff]  ;;  %v1186_v18 = vld [vmem:[%s1318_s2 + $0x28] sm:$0xff]  }
  0x2a   :  { %1018 = vmatpush3.bf16.msra.mxu1 %v1132_v23  ;;  %997 = vmatprep.subr.bf16.mxu0 %v1133_v24  ;;  %v905_v7 = vcombine.low %v43_v6, %v43_v6  ;;  %v906_v8 = vcombine.high %v43_v6, %v43_v6  ;;  %v44_v9 = vld [vmem:[%s1316_s0 + $0x18] sm:$0xff]  ;;  %v1183_v15 = vld [vmem:[%s1318_s2 + $0x10] sm:$0xff]  }
  0x2b   :  { %1019 = vmatprep.subr.bf16.mxu1 %v1134_v25  ;;  %v907_v10 = vcombine.low %v44_v9, %v44_v9  ;;  %v908_v11 = vcombine.high %v44_v9, %v44_v9  ;;  %v1184_v16 = vld [vmem:[%s1318_s2 + $0x18] sm:$0xff]   ;;  %v1187_v19 = vld [vmem:[%s1318_s2 + $0x30] sm:$0xff]  }
  0x2c   :  { %v1188_v20 = vld [vmem:[%s1318_s2 + $0x38] sm:$0xff]  }
  0x2d   :  { %998 = vmatpush3.bf16.msra.mxu0 %v1135_v26 }
  0x2e   :  { %1020 = vmatpush3.bf16.msra.mxu1 %v1136_v27  ;;  %999 = vmatprep.subr.bf16.mxu0 %v1137_v28 }
  0x2f   :  { %1021 = vmatprep.subr.bf16.mxu1 %v1138_v29 }
  0x31   :  { %1000 = vmatpush3.bf16.msra.mxu0 %v1139_v30 }
  0x32   :  { %1022 = vmatpush3.bf16.msra.mxu1 %v1140_v31  ;;  %1029 = vmatprep.subr.bf16.mxu0 %v1145_v38 }
  0x33   :  { %1051 = vmatprep.subr.bf16.mxu1 %v1146_v39 }
  0x34   :  { %618 = vmatmul.mubr.bf16.vlgmr.msra.gmra.mrb[0].mxu0 %v901_v34 }
  0x35   :  { %658 = vmatmul.mubr.bf16.vlgmr.msra.gmra.mrb[0].mxu1 %v903_v36  ;;  %1030 = vmatpush3.bf16.msra.mxu0 %v1147_v40 }
  0x36   :  { %1052 = vmatpush3.bf16.msra.mxu1 %v1148_v41  ;;  %1031 = vmatprep.subr.bf16.mxu0 %v1149_v42 }
  0x37   :  { %1053 = vmatprep.subr.bf16.mxu1 %v1150_v43  ;;  %697 = vmatprep.mubr.bf16.mxu0 %v906_v8  ;;  %v973_v43 = vld [vmem:[%s1320_s4] ss:$0 sm:$0xff] }
  0x38   :  { %737 = vmatprep.mubr.bf16.mxu1 %v908_v11 }
  0x39   :  { %1032 = vmatpush3.bf16.msra.mxu0 %v1151_v44 }
  0x3a   :  { %1054 = vmatpush3.bf16.msra.mxu1 %v1152_v45  ;;  %1033 = vmatprep.subr.bf16.mxu0 %v1153_v46 }
  0x3b   :  { %1055 = vmatprep.subr.bf16.mxu1 %v1154_v47 }
  0x3d   :  { %1034 = vmatpush3.bf16.msra.mxu0 %v1155_v48  ;;  %v872_v48 = vlaneseq }
  0x3e   :  { %1056 = vmatpush3.bf16.msra.mxu1 %v1156_v49  ;;  %1035 = vmatprep.subr.bf16.mxu0 %v1157_v50  ;;  %v870_v50 = vld [vmem:[%s1319_s3] sm:$0x1] }
  0x3f   :  { %1057 = vmatprep.subr.bf16.mxu1 %v1158_v51  ;;  %v873_v49 = vshrl.u32 %v872_v48, 7  ;;  %v871_v51 = vunpack.c.l.bf16 %v870_v50 }
  0x41   :  { %1036 = vmatpush3.bf16.msra.mxu0 %v1159_v52  ;;  %v874_v52 = vsub.s32 0, %v873_v49 }
  0x42   :  { %1058 = vmatpush3.bf16.msra.mxu1 %v1160_v53  ;;  %1037 = vmatprep.subr.bf16.mxu0 %v1161_v54  ;;  %v974_v53 = vld [vmem:[%s1320_s4 + $0x1] ss:$0 sm:$0xff] }
  0x43   :  { %1059 = vmatprep.subr.bf16.mxu1 %v1162_v55 }
  0x45   :  { %1038 = vmatpush3.bf16.msra.mxu0 %v1163_v56 }
  0x46   :  { %1060 = vmatpush3.bf16.msra.mxu1 %v1164_v57  ;;  %1039 = vmatprep.subr.bf16.mxu0 %v1165_v58  ;;  %v875_v57 = vrot.slane %v871_v51, %v874_v52 }
  0x47   :  { %1061 = vmatprep.subr.bf16.mxu1 %v1166_v59 }
  0x49   :  { %1040 = vmatpush3.bf16.msra.mxu0 %v1167_v60 }
  0x4a   :  { %1062 = vmatpush3.bf16.msra.mxu1 %v1168_v61  ;;  %1041 = vmatprep.subr.bf16.mxu0 %v1169_v62  ;;  %v1222_v62 = vmov 0  }
  0x4b   :  { %1063 = vmatprep.subr.bf16.mxu1 %v1170_v63  ;;  %1108 = vset.pattern.permute.xlu0 %v1222_v62  ;;  %v983_v63 = vld [vmem:[%s1320_s4 + $0x2] ss:$0 sm:$0xff] }
  0x4d   :  { %1042 = vmatpush3.bf16.msra.mxu0 %v1171_v0 }
  0x4e   :  { %1064 = vmatpush3.bf16.msra.mxu1 %v1172_v1  ;;  %1043 = vmatprep.subr.bf16.mxu0 %v1173_v2 }
  0x4f   :  { %1065 = vmatprep.subr.bf16.mxu1 %v1174_v3 }
  0x51   :  { %1044 = vmatpush3.bf16.msra.mxu0 %v1175_v4 }
  0x52   :  { %1066 = vmatpush3.bf16.msra.mxu1 %v1176_v5  ;;  %1082 = vmatprep.subr.bf16.mxu0 %v1220_v13 }
  0x54   :  { %698 = vmatmul.mubr.bf16.vlgmr.msra.gmra.mrb[4].mxu0 %v905_v7 }
  0x55   :  { %738 = vmatmul.mubr.bf16.vlgmr.msra.gmra.mrb[4].mxu1 %v907_v10  ;;  %1083 = vmatpush3.bf16.msra.mxu0 %v1181_v12 }
  0x56   :  { %1084 = vmatprep.subr.bf16.mxu0 %v1220_v13  ;;  %1098 = vmatprep.mubr.msk.bf16.mxu0 %vm1221_vm0, %v1220_v13 }
  0x59   :  { %1085 = vmatpush3.bf16.msra.mxu0 %v1182_v14 }
  0x5a   :  { %1086 = vmatprep.subr.bf16.mxu0 %v1220_v13 }
  0x5d   :  { %1087 = vmatpush3.bf16.msra.mxu0 %v1183_v15 }
  0x5e   :  { %1088 = vmatprep.subr.bf16.mxu0 %v1220_v13 }
  0x61   :  { %1089 = vmatpush3.bf16.msra.mxu0 %v1184_v16 }
  0x62   :  { %1090 = vmatprep.subr.bf16.mxu0 %v1220_v13 }
  0x65   :  { %1091 = vmatpush3.bf16.msra.mxu0 %v1185_v17 }
  0x66   :  { %1092 = vmatprep.subr.bf16.mxu0 %v1220_v13 }
  0x69   :  { %1093 = vmatpush3.bf16.msra.mxu0 %v1186_v18 }
  0x6a   :  { %1094 = vmatprep.subr.bf16.mxu0 %v1220_v13 }
  0x6d   :  { %1095 = vmatpush3.bf16.msra.mxu0 %v1187_v19 }
  0x6e   :  { %1096 = vmatprep.subr.bf16.mxu0 %v1220_v13 }
  0x71   :  { %1097 = vmatpush3.bf16.msra.mxu0 %v1188_v20 }
 0x107   :  { %v1001_v21 = vpop.f32.mrb[0].mxu0 }
 0x108   :  { %v1023_v22 = vpop.f32.mrb[0].mxu1  ;;  %v1002_v23 = vpop.f32.mrb[1].mxu0 }
 0x109   :  { %v1024_v24 = vpop.f32.mrb[1].mxu1  ;;  %v1003_v25 = vadd.f32 %v1002_v23, %v1001_v21  ;;  %v1004_v27 = vpop.f32.mrb[2].mxu0 }
 0x10a   :  { %v1025_v26 = vadd.f32 %v1024_v24, %v1023_v22  ;;  %v1026_v28 = vpop.f32.mrb[2].mxu1  ;;  %v1005_v29 = vpop.f32.mrb[3].mxu0 }
 0x10b   :  { %v1027_v30 = vpop.f32.mrb[3].mxu1 }
 0x10c   :  { %v660_v31 = vadd.f32 %v1025_v26, %v1003_v25 }
 0x127   :  { %v1045_v32 = vpop.f32.mrb[4].mxu0 }
 0x128   :  { %v1067_v33 = vpop.f32.mrb[4].mxu1  ;;  %v1046_v34 = vpop.f32.mrb[5].mxu0 }
 0x129   :  { %v1068_v35 = vpop.f32.mrb[5].mxu1  ;;  %v1047_v36 = vadd.f32 %v1046_v34, %v1045_v32  ;;  %v1048_v38 = vpop.f32.mrb[6].mxu0 }
 0x12a   :  { %v1069_v37 = vadd.f32 %v1068_v35, %v1067_v33  ;;  %v1070_v39 = vpop.f32.mrb[6].mxu1  ;;  %v1049_v40 = vpop.f32.mrb[7].mxu0 }
 0x12b   :  { %v1071_v41 = vpop.f32.mrb[7].mxu1  ;;  %v700_v42 = vadd.f32 %v1047_v36, %v660_v31 }
 0x12d   :  { %v740_v44 = vadd.f32 %v1069_v37, %v700_v42 }
 0x12f   :  { %v758_v45 = vadd.f32 %v973_v43, %v740_v44 }
 0x131   :  { %v759_v46 = vmax.f32 %v758_v45, 0.0 }
 0x133   :  { %v760_v47 = vpack.c.bf16 %v759_v46, %v759_v46 }
 0x135   :  { %1099 = vmatmul.mubr.bf16.vlgmr.msra.gmra.mrb[8].mxu0 %v760_v47 }
 0x208   :  { %v863_v54 = vpop.f32.mrb[8].mxu0 }
 0x209   :  { %v864_v55 = vadd.f32 %v974_v53, %v863_v54  ;;  %v1100_v56 = vpop.f32.mrb[9].mxu0 }
 0x20a   :  { %v866_v58 = vpop.f32.mrb[10].mxu0 }
 0x20b   :  { %v869_v59 = vmax.f32 %v864_v55, 0.0  ;;  %v1101_v60 = vpop.f32.mrb[11].mxu0 }
 0x20d   :  { %v876_v61 = vmul.f32 %v875_v57, %v869_v59 }
 0x20f   :  { %877 = vadd.xlane.f32.xlu0 %v876_v61 }
 0x29c   :  { %v878_v0 = vpop.xlane.xlu0 %877 }
 0x29d   :  { %v883_v1 = vadd.f32 %v983_v63, %v878_v0 }
 0x29f   :  { %v984_v2 = vmul.f32 -1.442695, %v883_v1 }
 0x2a1   :  { %1189 = vpow2.f32 %v984_v2 }
 0x2ab   :  { %v1190_v3 = vpop.eup %1189 }
 0x2ac   :  { %v887_v4 = vadd.f32 1.0, %v1190_v3 }
 0x2ae   :  { %1191 = vrcp.f32 %v887_v4 }
 0x2b8   :  { %v1192_v5 = vpop.eup %1191 }
 0x2b9   :  { %892 = vperm.xlu0 %1108, %v1192_v5  }
 0x338   :  { %v893_v6 = vpop.permute.xlu0 %892 }
 0x339   :  { %895 = vst [vmem:[%s1321_s5] sm:$0xff] %v893_v6 }
 0x33a   :  { %900 = vsyncpa [#allocation4], 1 }

</bundles_post_ra>
